<compile_context>
chip_gen: v6e
topology: v6e:2x2x1
jax: 0.10.0
libtpu: 0.0.40
codegen_flags: <defaults>
</compile_context>

<pallas_src>
import functools
import math

import jax
import jax.numpy as jnp
from jax.experimental import pallas as pl
from jax.experimental.pallas import tpu as pltpu

LANE = 128


def _round_up(n, m):
    return ((n + m - 1) // m) * m


def _largest_aligned_divisor(n, cap, align=LANE):
    """Largest multiple of `align` that divides n and is <= cap (n % align == 0)."""
    best = align
    d = align
    while d <= min(n, cap):
        if n % d == 0:
            best = d
        d += align
    return best


def _pick_tiling(n, *, tm_max=512, tk_max=2048,
                 hbm_sec_per_byte=0.7e-12, step_overhead_sec=0.35e-6):
    """Pick (npad, tm, tk): big tiles without inflating the (npad, npad) adj pad."""
    best = None
    for unit in (LANE, 256, 512, 1024, 2048):
        npad = _round_up(max(n, 1), unit)
        tm = _largest_aligned_divisor(npad, tm_max)
        tk = _largest_aligned_divisor(npad, tk_max)
        steps = (npad // tm) * (npad // tk)
        # bf16 adj is the dominant HBM stream; steps pay fixed pipeline overhead.
        cost = npad * npad * 2 * hbm_sec_per_byte + steps * step_overhead_sec
        if best is None or cost < best[0]:
            best = (cost, npad, tm, tk)
    return best[1], best[2], best[3]


# ---------------------------------------------------------------------------
# Kernel 1: dense feature transform  support = x @ W  (row-tiled, W resident)
# ---------------------------------------------------------------------------
def _linear_kernel(x_ref, w_ref, out_ref):
    out_ref[...] = jnp.dot(
        x_ref[...], w_ref[...], preferred_element_type=jnp.float32
    ).astype(out_ref.dtype)


def _linear(x, w, *, tm):
    n, fin = x.shape
    fout = w.shape[1]
    return pl.pallas_call(
        _linear_kernel,
        out_shape=jax.ShapeDtypeStruct((n, fout), x.dtype),
        grid=(n // tm,),
        in_specs=[
            pl.BlockSpec((tm, fin), lambda i: (i, 0)),
            pl.BlockSpec((fin, fout), lambda i: (0, 0)),
        ],
        out_specs=pl.BlockSpec((tm, fout), lambda i: (i, 0)),
        compiler_params=pltpu.CompilerParams(dimension_semantics=("parallel",)),
        cost_estimate=pl.CostEstimate(
            flops=2 * n * fin * fout,
            transcendentals=0,
            bytes_accessed=(n * fin + fin * fout + n * fout) * x.dtype.itemsize,
        ),
    )(x, w)


# ---------------------------------------------------------------------------
# Kernel 2: layer-1 aggregation fused with ReLU and the layer-2 transform:
#           out = relu(adj @ support1) @ W2
# ---------------------------------------------------------------------------
def _agg_relu_linear_kernel(adj_ref, sup_ref, w_ref, out_ref, acc_ref, *,
                            tk, sup_resident):
    k = pl.program_id(1)

    @pl.when(k == 0)
    def _():
        acc_ref[...] = jnp.zeros_like(acc_ref)

    if sup_resident:
        start = pl.multiple_of(k * tk, LANE)
        sup = sup_ref[pl.ds(start, tk), :]
    else:
        sup = sup_ref[...]

    acc_ref[...] += jnp.dot(adj_ref[...], sup, preferred_element_type=jnp.float32)

    @pl.when(k == pl.num_programs(1) - 1)
    def _():
        h = jnp.maximum(acc_ref[...], 0.0)
        # TODO(synk): training-mode dropout mask would be applied to `h` here.
        out_ref[...] = jnp.dot(
            h.astype(w_ref.dtype), w_ref[...],
            preferred_element_type=jnp.float32).astype(out_ref.dtype)


# ---------------------------------------------------------------------------
# Kernel 3: layer-2 aggregation fused with column-masked log_softmax:
#           out = log_softmax(adj @ support2, axis=1)  (valid cols = nclass)
# ---------------------------------------------------------------------------
def _agg_log_softmax_kernel(adj_ref, sup_ref, out_ref, acc_ref, *,
                            tk, sup_resident, nclass):
    k = pl.program_id(1)

    @pl.when(k == 0)
    def _():
        acc_ref[...] = jnp.zeros_like(acc_ref)

    if sup_resident:
        start = pl.multiple_of(k * tk, LANE)
        sup = sup_ref[pl.ds(start, tk), :]
    else:
        sup = sup_ref[...]

    acc_ref[...] += jnp.dot(adj_ref[...], sup, preferred_element_type=jnp.float32)

    @pl.when(k == pl.num_programs(1) - 1)
    def _():
        logits = acc_ref[...]
        col = jax.lax.broadcasted_iota(jnp.int32, logits.shape, 1)
        valid = col < nclass
        masked = jnp.where(valid, logits, -1e30)          # kill padded class cols
        m = jnp.max(masked, axis=1, keepdims=True)
        z = masked - m
        lse = jnp.log(jnp.sum(jnp.exp(z), axis=1, keepdims=True))
        out_ref[...] = jnp.where(valid, z - lse, 0.0).astype(out_ref.dtype)


def _aggregate(kernel_fn, adj, sup, extra, *, tm, tk, acc_cols, out_cols,
               out_dtype, transcendentals=0, static_kwargs=None):
    n = adj.shape[0]
    sup_cols = sup.shape[1]
    out_itemsize = jnp.dtype(out_dtype).itemsize

    # Keep the whole support operand VMEM-resident (constant index_map -> fetched
    # once per call) when its double-buffered footprint is modest; otherwise
    # fall back to streaming one (tk, cols) K-tile per step.
    sup_bytes_db = 2 * sup.size * sup.dtype.itemsize
    sup_resident = sup_bytes_db <= 16 * 2**20

    in_specs = [pl.BlockSpec((tm, tk), lambda i, k: (i, k))]          # adj tile
    if sup_resident:
        in_specs.append(pl.BlockSpec((n, sup_cols), lambda i, k: (0, 0)))
    else:
        in_specs.append(pl.BlockSpec((tk, sup_cols), lambda i, k: (k, 0)))
    for a in extra:                                                   # small resident weights
        in_specs.append(pl.BlockSpec(a.shape, lambda i, k: (0, 0)))

    kernel = functools.partial(kernel_fn, tk=tk, sup_resident=sup_resident,
                               **(static_kwargs or {}))

    est_vmem = (
        2 * tm * tk * adj.dtype.itemsize
        + (sup_bytes_db if sup_resident else 2 * tk * sup_cols * sup.dtype.itemsize)
        + 2 * tm * out_cols * out_itemsize
        + tm * acc_cols * 4
        + sum(2 * a.size * a.dtype.itemsize for a in extra)
    )
    # Explicit scoped-VMEM limit (v5e default is only 16 MiB); stay under v7x's
    # 64 MiB physical VMEM per TensorCore.
    vmem_limit = int(max(32 * 2**20, min(64 * 2**20, est_vmem * 5 // 4)))

    flops = 2 * n * n * sup_cols + sum(2 * n * a.shape[0] * a.shape[1] for a in extra)
    bytes_accessed = (
        adj.size * adj.dtype.itemsize
        + (1 if sup_resident else n // tm) * sup.size * sup.dtype.itemsize
        + n * out_cols * out_itemsize
        + sum(a.size * a.dtype.itemsize for a in extra)
    )

    return pl.pallas_call(
        kernel,
        out_shape=jax.ShapeDtypeStruct((n, out_cols), out_dtype),
        grid=(n // tm, n // tk),
        in_specs=in_specs,
        out_specs=pl.BlockSpec((tm, out_cols), lambda i, k: (i, 0)),
        scratch_shapes=[pltpu.VMEM((tm, acc_cols), jnp.float32)],
        compiler_params=pltpu.CompilerParams(
            dimension_semantics=("parallel", "arbitrary"),
            vmem_limit_bytes=vmem_limit),
        cost_estimate=pl.CostEstimate(
            flops=flops, transcendentals=transcendentals,
            bytes_accessed=bytes_accessed),
    )(adj, sup, *extra)


# ---------------------------------------------------------------------------
# Full forward
# ---------------------------------------------------------------------------
def gcn_forward(x, adj, w1, w2, *, tm_max=512, tk_max=2048):
    n, nfeat = x.shape
    nhid = w1.shape[1]
    nclass = w2.shape[1]

    dt = jnp.bfloat16
    npad, tm, tk = _pick_tiling(n, tm_max=tm_max, tk_max=tk_max)
    fpad = _round_up(nfeat, LANE)
    hpad = _round_up(nhid, LANE)
    cpad = _round_up(nclass, LANE)

    # Zero padding composes exactly through the linear layers / aggregation.
    xp = jnp.zeros((npad, fpad), dt).at[:n, :nfeat].set(x.astype(dt))
    adjp = jnp.zeros((npad, npad), dt).at[:n, :n].set(adj.astype(dt))
    w1p = jnp.zeros((fpad, hpad), dt).at[:nfeat, :nhid].set(w1.astype(dt))
    w2p = jnp.zeros((hpad, cpad), dt).at[:nhid, :nclass].set(w2.astype(dt))

    # support1 = x @ W1
    sup1 = _linear(xp, w1p, tm=tm)

    # support2 = relu(adj @ support1) @ W2   (ReLU + layer-2 transform fused)
    sup2 = _aggregate(_agg_relu_linear_kernel, adjp, sup1, (w2p,),
                      tm=tm, tk=tk, acc_cols=hpad, out_cols=cpad, out_dtype=dt)

    # out = log_softmax(adj @ support2)      (class padding masked in-kernel)
    out = _aggregate(_agg_log_softmax_kernel, adjp, sup2, (),
                     tm=tm, tk=tk, acc_cols=cpad, out_cols=cpad,
                     out_dtype=jnp.float32, transcendentals=npad * cpad,
                     static_kwargs={"nclass": nclass})

    return out[:n, :nclass]


# ---------------------------------------------------------------------------
# Reference / self-test
# ---------------------------------------------------------------------------
def init_gc_weight(key, in_features, out_features):
    # Matches GraphConvolution.reset_parameters: U(-stdv, stdv), stdv=1/sqrt(out)
    stdv = 1.0 / math.sqrt(out_features)
    return jax.random.uniform(key, (in_features, out_features),
                              dtype=jnp.float32, minval=-stdv, maxval=stdv)


def _mm(a, b):
    return jnp.dot(a, b, precision=jax.lax.Precision.HIGHEST)


def gcn_reference_bf16(x, adj, w1, w2):
    """Mirrors the kernel's bf16 input/intermediate rounding with f32 accumulation."""
    dt, f32 = jnp.bfloat16, jnp.float32
    xb, ab, w1b, w2b = (a.astype(dt).astype(f32) for a in (x, adj, w1, w2))
    s1 = _mm(xb, w1b).astype(dt).astype(f32)
    h1 = jnp.maximum(_mm(ab, s1), 0.0)
    s2 = _mm(h1.astype(dt).astype(f32), w2b).astype(dt).astype(f32)
    h2 = _mm(ab, s2)
    return jax.nn.log_softmax(h2, axis=1)


def _make_inputs(key, n, nfeat, nhid, nclass):
    k_x, k_adj, k_w1, k_w2 = jax.random.split(key, 4)
    x = jax.random.normal(k_x, (n, nfeat), dtype=jnp.float32)
    # Symmetric row-normalized adjacency with self-loops (dense stand-in for spmm).
    a = (jax.random.uniform(k_adj, (n, n)) < 0.3).astype(jnp.float32)
    a = jnp.maximum(a, a.T) + jnp.eye(n, dtype=jnp.float32)
    adj = a / jnp.sum(a, axis=1, keepdims=True)
    w1 = init_gc_weight(k_w1, nfeat, nhid)
    w2 = init_gc_weight(k_w2, nhid, nclass)
    return x, adj, w1, w2


if __name__ == "__main__":
    # --- test 1: small shapes, single-tile grid -----------------------------
    N, nfeat, nhid, nclass = 16, 8, 32, 4
    x, adj, w1, w2 = _make_inputs(jax.random.PRNGKey(0), N, nfeat, nhid, nclass)

    out = jax.jit(gcn_forward)(x, adj, w1, w2)
    jax.block_until_ready(out)
    assert out.shape == (N, nclass)

    ref = gcn_reference_bf16(x, adj, w1, w2)
    assert jnp.allclose(out, ref, atol=2e-3, rtol=2e-3), \
        float(jnp.max(jnp.abs(out - ref)))

    # Loose sanity check vs the full-f32 reference (bf16 inputs lose mantissa).
    h1_f32 = jnp.maximum(_mm(adj, _mm(x, w1)), 0.0)
    ref_f32 = jax.nn.log_softmax(_mm(adj, _mm(h1_f32, w2)), axis=1)
    assert jnp.allclose(out, ref_f32, atol=5e-2, rtol=5e-2)

    # --- test 2: ragged N, small tile caps -> multi-step K reduction exercises
    #             the resident-support pl.ds slicing and accumulator gating ----
    N2 = 300
    x2, adj2, w12, w22 = _make_inputs(jax.random.PRNGKey(1), N2, nfeat, nhid, nclass)
    fwd_small_tiles = jax.jit(functools.partial(gcn_forward, tm_max=128, tk_max=128))
    out2 = fwd_small_tiles(x2, adj2, w12, w22)
    jax.block_until_ready(out2)
    assert out2.shape == (N2, nclass)
    ref2 = gcn_reference_bf16(x2, adj2, w12, w22)
    assert jnp.allclose(out2, ref2, atol=5e-3, rtol=5e-3), \
        float(jnp.max(jnp.abs(out2 - ref2)))

    print("KERNEL_OK")
</pallas_src>

<mosaic_0001>
module attributes {stable_mosaic.version = 11 : i64} {
  func.func @_linear_kernel(%arg0: i32, %arg1: memref<128x128xbf16, #tpu.memory_space<vmem>>, %arg2: memref<128x128xbf16, #tpu.memory_space<vmem>>, %arg3: memref<128x128xbf16, #tpu.memory_space<vmem>>) attributes {dimension_semantics = [#tpu.dimension_semantics<parallel>], iteration_bounds = array<i64: 1>, scalar_prefetch = 0 : i64, scratch_operands = 0 : i64, tpu.core_type = #tpu.core_type<tc>, window_params = [{transform_indices = @transform_0, window_bounds = array<i64: 128, 128>}, {pipeline_mode = #tpu.pipeline_mode<synchronous>, transform_indices = @transform_1, window_bounds = array<i64: 128, 128>}, {transform_indices = @transform_2, window_bounds = array<i64: 128, 128>}]} {
    %c0 = arith.constant 0 : index
    %c0_0 = arith.constant 0 : index
    %0 = vector.load %arg1[%c0, %c0_0] : memref<128x128xbf16, #tpu.memory_space<vmem>>, vector<128x128xbf16>
    %c0_1 = arith.constant 0 : index
    %c0_2 = arith.constant 0 : index
    %1 = vector.load %arg2[%c0_1, %c0_2] : memref<128x128xbf16, #tpu.memory_space<vmem>>, vector<128x128xbf16>
    %cst = arith.constant dense<0.000000e+00> : vector<128x128xf32>
    %2 = tpu.matmul %0, %1, %cst {dimension_numbers = #tpu.dot_dimension_numbers<[1], [0], [0], [1], [0, 0, 1, 1], [], []>} : vector<128x128xbf16>, vector<128x128xbf16>, vector<128x128xf32> -> vector<128x128xf32>
    %3 = arith.truncf %2 : vector<128x128xf32> to vector<128x128xbf16>
    %c0_3 = arith.constant 0 : index
    %c0_4 = arith.constant 0 : index
    %4 = vector.load %arg3[%c0_3, %c0_4] : memref<128x128xbf16, #tpu.memory_space<vmem>>, vector<128x128xbf16>
    tpu.vector_store %arg3[%c0_3, %c0_4], %3 {strides = array<i32>} : memref<128x128xbf16, #tpu.memory_space<vmem>>, vector<128x128xbf16>,
    return
  }
  func.func @transform_0(%arg0: i32) -> (i32, i32) {
    %c0_i32 = arith.constant 0 : i32
    %c0_i32_0 = arith.constant 0 : i32
    return %arg0, %c0_i32 : i32, i32
  }
  func.func @transform_1(%arg0: i32) -> (i32, i32) {
    %c0_i32 = arith.constant 0 : i32
    %c0_i32_0 = arith.constant 0 : i32
    %c0_i32_1 = arith.constant 0 : i32
    return %c0_i32, %c0_i32_0 : i32, i32
  }
  func.func @transform_2(%arg0: i32) -> (i32, i32) {
    %c0_i32 = arith.constant 0 : i32
    %c0_i32_0 = arith.constant 0 : i32
    return %arg0, %c0_i32 : i32, i32
  }
}

module attributes {stable_mosaic.version = 11 : i64} {
  func.func @_agg_relu_linear_kernel(%arg0: i32, %arg1: i32, %arg2: memref<128x128xbf16, #tpu.memory_space<vmem>>, %arg3: memref<128x128xbf16, #tpu.memory_space<vmem>>, %arg4: memref<128x128xbf16, #tpu.memory_space<vmem>>, %arg5: memref<128x128xbf16, #tpu.memory_space<vmem>>, %arg6: memref<128x128xf32, #tpu.memory_space<vmem>>) attributes {dimension_semantics = [#tpu.dimension_semantics<parallel>, #tpu.dimension_semantics<arbitrary>], iteration_bounds = array<i64: 1, 1>, scalar_prefetch = 0 : i64, scratch_operands = 1 : i64, tpu.core_type = #tpu.core_type<tc>, window_params = [{transform_indices = @transform_0, window_bounds = array<i64: 128, 128>}, {pipeline_mode = #tpu.pipeline_mode<synchronous>, transform_indices = @transform_1, window_bounds = array<i64: 128, 128>}, {pipeline_mode = #tpu.pipeline_mode<synchronous>, transform_indices = @transform_2, window_bounds = array<i64: 128, 128>}, {transform_indices = @transform_3, window_bounds = array<i64: 128, 128>}]} {
    %c0_i32 = arith.constant 0 : i32
    %0 = arith.cmpi eq, %arg1, %c0_i32 : i32
    %1 = arith.extui %0 : i1 to i32
    %c0_i32_0 = arith.constant 0 : i32
    %2 = arith.cmpi ne, %1, %c0_i32_0 : i32
    scf.if %2 {
      %cst_9 = arith.constant 0.000000e+00 : f32
      %15 = vector.broadcast %cst_9 : f32 to vector<128x128xf32>
      %c0_10 = arith.constant 0 : index
      %c0_11 = arith.constant 0 : index
      %16 = vector.load %arg6[%c0_10, %c0_11] : memref<128x128xf32, #tpu.memory_space<vmem>>, vector<128x128xf32>
      tpu.vector_store %arg6[%c0_10, %c0_11], %15 {strides = array<i32>} : memref<128x128xf32, #tpu.memory_space<vmem>>, vector<128x128xf32>,
    } else {
    }
    %c128_i32 = arith.constant 128 : i32
    %3 = arith.muli %arg1, %c128_i32 : i32
    %4 = tpu.assume_multiple %3, 128 : i32
    %5 = arith.index_cast %4 : i32 to index
    %c0 = arith.constant 0 : index
    %6 = vector.load %arg3[%5, %c0] : memref<128x128xbf16, #tpu.memory_space<vmem>>, vector<128x128xbf16>
    %c0_1 = arith.constant 0 : index
    %c0_2 = arith.constant 0 : index
    %7 = vector.load %arg6[%c0_1, %c0_2] : memref<128x128xf32, #tpu.memory_space<vmem>>, vector<128x128xf32>
    %c0_3 = arith.constant 0 : index
    %c0_4 = arith.constant 0 : index
    %8 = vector.load %arg2[%c0_3, %c0_4] : memref<128x128xbf16, #tpu.memory_space<vmem>>, vector<128x128xbf16>
    %cst = arith.constant dense<0.000000e+00> : vector<128x128xf32>
    %9 = tpu.matmul %8, %6, %cst {dimension_numbers = #tpu.dot_dimension_numbers<[1], [0], [0], [1], [0, 0, 1, 1], [], []>} : vector<128x128xbf16>, vector<128x128xbf16>, vector<128x128xf32> -> vector<128x128xf32>
    %10 = arith.addf %7, %9 : vector<128x128xf32>
    %c0_5 = arith.constant 0 : index
    %c0_6 = arith.constant 0 : index
    %11 = vector.load %arg6[%c0_5, %c0_6] : memref<128x128xf32, #tpu.memory_space<vmem>>, vector<128x128xf32>
    tpu.vector_store %arg6[%c0_5, %c0_6], %10 {strides = array<i32>} : memref<128x128xf32, #tpu.memory_space<vmem>>, vector<128x128xf32>,
    %c0_i32_7 = arith.constant 0 : i32
    %12 = arith.cmpi eq, %arg1, %c0_i32_7 : i32
    %13 = arith.extui %12 : i1 to i32
    %c0_i32_8 = arith.constant 0 : i32
    %14 = arith.cmpi ne, %13, %c0_i32_8 : i32
    scf.if %14 {
      %c0_9 = arith.constant 0 : index
      %c0_10 = arith.constant 0 : index
      %15 = vector.load %arg6[%c0_9, %c0_10] : memref<128x128xf32, #tpu.memory_space<vmem>>, vector<128x128xf32>
      %cst_11 = arith.constant 0.000000e+00 : f32
      %16 = vector.broadcast %cst_11 : f32 to vector<128x128xf32>
      %17 = arith.maximumf %15, %16 : vector<128x128xf32>
      %18 = arith.truncf %17 : vector<128x128xf32> to vector<128x128xbf16>
      %c0_12 = arith.constant 0 : index
      %c0_13 = arith.constant 0 : index
      %19 = vector.load %arg4[%c0_12, %c0_13] : memref<128x128xbf16, #tpu.memory_space<vmem>>, vector<128x128xbf16>
      %cst_14 = arith.constant dense<0.000000e+00> : vector<128x128xf32>
      %20 = tpu.matmul %18, %19, %cst_14 {dimension_numbers = #tpu.dot_dimension_numbers<[1], [0], [0], [1], [0, 0, 1, 1], [], []>} : vector<128x128xbf16>, vector<128x128xbf16>, vector<128x128xf32> -> vector<128x128xf32>
      %21 = arith.truncf %20 : vector<128x128xf32> to vector<128x128xbf16>
      %c0_15 = arith.constant 0 : index
      %c0_16 = arith.constant 0 : index
      %22 = vector.load %arg5[%c0_15, %c0_16] : memref<128x128xbf16, #tpu.memory_space<vmem>>, vector<128x128xbf16>
      tpu.vector_store %arg5[%c0_15, %c0_16], %21 {strides = array<i32>} : memref<128x128xbf16, #tpu.memory_space<vmem>>, vector<128x128xbf16>,
    } else {
    }
    return
  }
  func.func @transform_0(%arg0: i32, %arg1: i32) -> (i32, i32) {
    %c0_i32 = arith.constant 0 : i32
    return %arg0, %arg1 : i32, i32
  }
  func.func @transform_1(%arg0: i32, %arg1: i32) -> (i32, i32) {
    %c0_i32 = arith.constant 0 : i32
    %c0_i32_0 = arith.constant 0 : i32
    %c0_i32_1 = arith.constant 0 : i32
    return %c0_i32, %c0_i32_0 : i32, i32
  }
  func.func @transform_2(%arg0: i32, %arg1: i32) -> (i32, i32) {
    %c0_i32 = arith.constant 0 : i32
    %c0_i32_0 = arith.constant 0 : i32
    %c0_i32_1 = arith.constant 0 : i32
    return %c0_i32, %c0_i32_0 : i32, i32
  }
  func.func @transform_3(%arg0: i32, %arg1: i32) -> (i32, i32) {
    %c0_i32 = arith.constant 0 : i32
    %c0_i32_0 = arith.constant 0 : i32
    return %arg0, %c0_i32 : i32, i32
  }
}

module attributes {stable_mosaic.version = 11 : i64} {
  func.func @_agg_log_softmax_kernel(%arg0: i32, %arg1: i32, %arg2: memref<128x128xbf16, #tpu.memory_space<vmem>>, %arg3: memref<128x128xbf16, #tpu.memory_space<vmem>>, %arg4: memref<128x128xf32, #tpu.memory_space<vmem>>, %arg5: memref<128x128xf32, #tpu.memory_space<vmem>>) attributes {dimension_semantics = [#tpu.dimension_semantics<parallel>, #tpu.dimension_semantics<arbitrary>], iteration_bounds = array<i64: 1, 1>, scalar_prefetch = 0 : i64, scratch_operands = 1 : i64, tpu.core_type = #tpu.core_type<tc>, window_params = [{transform_indices = @transform_0, window_bounds = array<i64: 128, 128>}, {pipeline_mode = #tpu.pipeline_mode<synchronous>, transform_indices = @transform_1, window_bounds = array<i64: 128, 128>}, {transform_indices = @transform_2, window_bounds = array<i64: 128, 128>}]} {
    %c0_i32 = arith.constant 0 : i32
    %0 = arith.cmpi eq, %arg1, %c0_i32 : i32
    %1 = arith.extui %0 : i1 to i32
    %c0_i32_0 = arith.constant 0 : i32
    %2 = arith.cmpi ne, %1, %c0_i32_0 : i32
    scf.if %2 {
      %cst_9 = arith.constant 0.000000e+00 : f32
      %15 = vector.broadcast %cst_9 : f32 to vector<128x128xf32>
      %c0_10 = arith.constant 0 : index
      %c0_11 = arith.constant 0 : index
      %16 = vector.load %arg5[%c0_10, %c0_11] : memref<128x128xf32, #tpu.memory_space<vmem>>, vector<128x128xf32>
      tpu.vector_store %arg5[%c0_10, %c0_11], %15 {strides = array<i32>} : memref<128x128xf32, #tpu.memory_space<vmem>>, vector<128x128xf32>,
    } else {
    }
    %c128_i32 = arith.constant 128 : i32
    %3 = arith.muli %arg1, %c128_i32 : i32
    %4 = tpu.assume_multiple %3, 128 : i32
    %5 = arith.index_cast %4 : i32 to index
    %c0 = arith.constant 0 : index
    %6 = vector.load %arg3[%5, %c0] : memref<128x128xbf16, #tpu.memory_space<vmem>>, vector<128x128xbf16>
    %c0_1 = arith.constant 0 : index
    %c0_2 = arith.constant 0 : index
    %7 = vector.load %arg5[%c0_1, %c0_2] : memref<128x128xf32, #tpu.memory_space<vmem>>, vector<128x128xf32>
    %c0_3 = arith.constant 0 : index
    %c0_4 = arith.constant 0 : index
    %8 = vector.load %arg2[%c0_3, %c0_4] : memref<128x128xbf16, #tpu.memory_space<vmem>>, vector<128x128xbf16>
    %cst = arith.constant dense<0.000000e+00> : vector<128x128xf32>
    %9 = tpu.matmul %8, %6, %cst {dimension_numbers = #tpu.dot_dimension_numbers<[1], [0], [0], [1], [0, 0, 1, 1], [], []>} : vector<128x128xbf16>, vector<128x128xbf16>, vector<128x128xf32> -> vector<128x128xf32>
    %10 = arith.addf %7, %9 : vector<128x128xf32>
    %c0_5 = arith.constant 0 : index
    %c0_6 = arith.constant 0 : index
    %11 = vector.load %arg5[%c0_5, %c0_6] : memref<128x128xf32, #tpu.memory_space<vmem>>, vector<128x128xf32>
    tpu.vector_store %arg5[%c0_5, %c0_6], %10 {strides = array<i32>} : memref<128x128xf32, #tpu.memory_space<vmem>>, vector<128x128xf32>,
    %c0_i32_7 = arith.constant 0 : i32
    %12 = arith.cmpi eq, %arg1, %c0_i32_7 : i32
    %13 = arith.extui %12 : i1 to i32
    %c0_i32_8 = arith.constant 0 : i32
    %14 = arith.cmpi ne, %13, %c0_i32_8 : i32
    scf.if %14 {
      %c0_9 = arith.constant 0 : index
      %c0_10 = arith.constant 0 : index
      %15 = vector.load %arg5[%c0_9, %c0_10] : memref<128x128xf32, #tpu.memory_space<vmem>>, vector<128x128xf32>
      %16 = tpu.iota {dimensions = array<i32: 1>} : vector<128x128xi32>
      %c4_i32 = arith.constant 4 : i32
      %17 = vector.broadcast %c4_i32 : i32 to vector<128x128xi32>
      %18 = arith.cmpi slt, %16, %17 : vector<128x128xi32>
      %cst_11 = arith.constant -1.000000e+30 : f32
      %19 = vector.broadcast %cst_11 : f32 to vector<128x128xf32>
      %20 = arith.select %18, %15, %19 : vector<128x128xi1>, vector<128x128xf32>
      %cst_12 = arith.constant dense<0xFF800000> : vector<128xf32>
      %21 = vector.multi_reduction <maximumf>, %20, %cst_12 [1] : vector<128x128xf32> to vector<128xf32>
      %22 = vector.shape_cast %21 : vector<128xf32> to vector<128x1xf32>
      %23 = vector.broadcast %22 : vector<128x1xf32> to vector<128x128xf32>
      %24 = arith.subf %20, %23 : vector<128x128xf32>
      %25 = math.exp %24 : vector<128x128xf32>
      %cst_13 = arith.constant dense<0.000000e+00> : vector<128xf32>
      %26 = vector.multi_reduction <add>, %25, %cst_13 [1] : vector<128x128xf32> to vector<128xf32>
      %27 = vector.shape_cast %26 : vector<128xf32> to vector<128x1xf32>
      %28 = math.log %27 : vector<128x1xf32>
      %29 = vector.broadcast %28 : vector<128x1xf32> to vector<128x128xf32>
      %30 = arith.subf %24, %29 : vector<128x128xf32>
      %cst_14 = arith.constant 0.000000e+00 : f32
      %31 = vector.broadcast %cst_14 : f32 to vector<128x128xf32>
      %32 = arith.select %18, %30, %31 : vector<128x128xi1>, vector<128x128xf32>
      %c0_15 = arith.constant 0 : index
      %c0_16 = arith.constant 0 : index
      %33 = vector.load %arg4[%c0_15, %c0_16] : memref<128x128xf32, #tpu.memory_space<vmem>>, vector<128x128xf32>
      tpu.vector_store %arg4[%c0_15, %c0_16], %32 {strides = array<i32>} : memref<128x128xf32, #tpu.memory_space<vmem>>, vector<128x128xf32>,
    } else {
    }
    return
  }
  func.func @transform_0(%arg0: i32, %arg1: i32) -> (i32, i32) {
    %c0_i32 = arith.constant 0 : i32
    return %arg0, %arg1 : i32, i32
  }
  func.func @transform_1(%arg0: i32, %arg1: i32) -> (i32, i32) {
    %c0_i32 = arith.constant 0 : i32
    %c0_i32_0 = arith.constant 0 : i32
    %c0_i32_1 = arith.constant 0 : i32
    return %c0_i32, %c0_i32_0 : i32, i32
  }
  func.func @transform_2(%arg0: i32, %arg1: i32) -> (i32, i32) {
    %c0_i32 = arith.constant 0 : i32
    %c0_i32_0 = arith.constant 0 : i32
    return %arg0, %c0_i32 : i32, i32
  }
}

</mosaic_0001>

<bundles_post_ra>
// kernel: gcn_forward.5
= control target key start
LH: loop header
LB: loop body
LE: loop exit
PB: predicated region body
PF: predicated region fallthrough
CT: control target
= control target key end

     0   :  { %v329_v16 = vlaneseq  ;;  %s960_s1 = inlined_call_operand.vmem [shape: bf16[128,128], index: 1, kind: input, shape index: {}]   ;;  %s961_s0 = inlined_call_operand.vmem [shape: bf16[128,128], index: 0, kind: input, shape index: {}]   ;;  %s962_s2 = inlined_call_operand.vmem [shape: f32[128,128], index: 2, kind: output, shape index: {}]  }
   0x1   :  { %v626_v0 = vld [vmem:[%s960_s1 + $0x38] sm:$0xff]   ;;  %v627_v1 = vld [vmem:[%s960_s1 + $0x30] sm:$0xff]   ;;  %v628_v2 = vld [vmem:[%s960_s1 + $0x28] sm:$0xff]  }
   0x2   :  { %578 = vmatprep.subr.bf16.mxu0 %v626_v0  ;;  %610 = vmatprep.subr.bf16.mxu1 %v626_v0  ;;  %v629_v3 = vld [vmem:[%s960_s1 + $0x20] sm:$0xff]   ;;  %v630_v6 = vld [vmem:[%s960_s1 + $0x18] sm:$0xff]   ;;  %v631_v7 = vld [vmem:[%s960_s1 + $0x10] sm:$0xff]   ;;  %v769_v17 = vand.u32 127, %v329_v16 }
   0x3   :  { %579 = vmatpush3.bf16.msra.mxu0 %v626_v0  ;;  %618 = vmatpush3.bf16.msra.mxu1 %v626_v0  ;;  %v634_v4 = vld [vmem:[%s961_s0] sm:$0xff]   ;;  %v632_v8 = vld [vmem:[%s960_s1 + $0x8] sm:$0xff]   ;;  %v638_v12 = vld [vmem:[%s961_s0 + $0x10] sm:$0xff]  }
   0x4   :  { %580 = vmatprep.subr.bf16.mxu0 %v627_v1  ;;  %611 = vmatprep.subr.bf16.mxu1 %v627_v1  ;;  %v635_v5 = vld [vmem:[%s961_s0 + $0x20] sm:$0xff]   ;;  %v636_v10 = vld [vmem:[%s961_s0 + $0x8] sm:$0xff]   ;;  %v640_v13 = vld [vmem:[%s961_s0 + $0x30] sm:$0xff]   ;;  %vm331_vm0 = vcmp.lt.s32.totalorder %v769_v17, 4 }
   0x5   :  { %594 = vmatprep.mubr.bf16.mxu0 %v634_v4  ;;  %602 = vmatprep.mubr.bf16.mxu1 %v635_v5  ;;  %v633_v9 = vld [vmem:[%s960_s1] sm:$0xff]   ;;  %v637_v11 = vld [vmem:[%s961_s0 + $0x28] sm:$0xff]   ;;  %v639_v14 = vld [vmem:[%s961_s0 + $0x18] sm:$0xff]  }
   0x6   :  { %v641_v15 = vld [vmem:[%s961_s0 + $0x38] sm:$0xff]  }
   0x7   :  { %581 = vmatpush3.bf16.msra.mxu0 %v627_v1  ;;  %619 = vmatpush3.bf16.msra.mxu1 %v627_v1 }
   0x8   :  { %582 = vmatprep.subr.bf16.mxu0 %v628_v2  ;;  %612 = vmatprep.subr.bf16.mxu1 %v628_v2 }
   0xb   :  { %583 = vmatpush3.bf16.msra.mxu0 %v628_v2  ;;  %620 = vmatpush3.bf16.msra.mxu1 %v628_v2 }
   0xc   :  { %584 = vmatprep.subr.bf16.mxu0 %v629_v3  ;;  %613 = vmatprep.subr.bf16.mxu1 %v629_v3 }
   0xf   :  { %585 = vmatpush3.bf16.msra.mxu0 %v629_v3  ;;  %621 = vmatpush3.bf16.msra.mxu1 %v629_v3 }
  0x10   :  { %586 = vmatprep.subr.bf16.mxu0 %v630_v6  ;;  %614 = vmatprep.subr.bf16.mxu1 %v630_v6 }
  0x13   :  { %587 = vmatpush3.bf16.msra.mxu0 %v630_v6  ;;  %622 = vmatpush3.bf16.msra.mxu1 %v630_v6 }
  0x14   :  { %588 = vmatprep.subr.bf16.mxu0 %v631_v7  ;;  %615 = vmatprep.subr.bf16.mxu1 %v631_v7 }
  0x17   :  { %589 = vmatpush3.bf16.msra.mxu0 %v631_v7  ;;  %623 = vmatpush3.bf16.msra.mxu1 %v631_v7 }
  0x18   :  { %590 = vmatprep.subr.bf16.mxu0 %v632_v8  ;;  %616 = vmatprep.subr.bf16.mxu1 %v632_v8 }
  0x1b   :  { %591 = vmatpush3.bf16.msra.mxu0 %v632_v8  ;;  %624 = vmatpush3.bf16.msra.mxu1 %v632_v8 }
  0x1c   :  { %592 = vmatprep.subr.bf16.mxu0 %v633_v9  ;;  %617 = vmatprep.subr.bf16.mxu1 %v633_v9 }
  0x1f   :  { %593 = vmatpush3.bf16.msra.mxu0 %v633_v9  ;;  %625 = vmatpush3.bf16.msra.mxu1 %v633_v9 }
  0x22   :  { %595 = vmatmul.mubr.bf16.vlgmr.msra.gmra.mxu0 %v636_v10  ;;  %603 = vmatmul.mubr.bf16.vlgmr.msra.gmra.mxu1 %v637_v11 }
  0x23   :  { %598 = vmatprep.mubr.bf16.mxu0 %v638_v12  ;;  %606 = vmatprep.mubr.bf16.mxu1 %v640_v13 }
  0x2a   :  { %599 = vmatmul.mubr.bf16.gmra.mxu0 %v639_v14  ;;  %607 = vmatmul.mubr.bf16.gmra.mxu1 %v641_v15 }
  0xe2   :  { %v596_v18 = vpop.f32.mrf.mxu0  ;;  %v604_v19 = vpop.f32.mrf.mxu1 }
  0xe3   :  { %v342_v20 = vsel %vm331_vm0, %v604_v19, -1e+30  ;;  %v334_v21 = vsel %vm331_vm0, %v596_v18, -1e+30 }
  0xe4   :  { %368 = vmax.xlane.f32.xlu0 %v342_v20  ;;  %v247_v22 = vpop.f32.mrf.mxu1  ;;  %352 = vmax.xlane.f32.xlu1 %v334_v21  ;;  %v215_v23 = vpop.f32.mrf.mxu0 }
  0xe5   :  { %v332_v26 = vsel %vm331_vm0, %v215_v23, -1e+30  ;;  %v340_v31 = vsel %vm331_vm0, %v247_v22, -1e+30 }
  0xe6   :  { %v597_v24 = vpop.f32.mrf.mxu0  ;;  %v605_v25 = vpop.f32.mrf.mxu1 }
  0xe7   :  { %v335_v27 = vsel %vm331_vm0, %v597_v24, -1e+30  ;;  %v343_v32 = vsel %vm331_vm0, %v605_v25, -1e+30 }
  0xe8   :  { %348 = vmax.xlane.f32.xlu0 %v332_v26  ;;  %354 = vmax.xlane.f32.xlu1 %v335_v27  ;;  %v218_v28 = vpop.f32.mrf.mxu0  ;;  %v250_v29 = vpop.f32.mrf.mxu1 }
  0xe9   :  { %v341_v35 = vsel %vm331_vm0, %v250_v29, -1e+30  ;;  %v333_v36 = vsel %vm331_vm0, %v218_v28, -1e+30 }
  0xea   :  { %v600_v30 = vpop.f32.mrf.mxu0  ;;  %v608_v34 = vpop.f32.mrf.mxu1 }
  0xeb   :  { %v338_v39 = vsel %vm331_vm0, %v600_v30, -1e+30  ;;  %v805_v48 = vsel %vm331_vm0, %v608_v34, -1e+30 }
  0xec   :  { %364 = vmax.xlane.f32.xlu0 %v340_v31  ;;  %370 = vmax.xlane.f32.xlu1 %v343_v32  ;;  %v231_v33 = vpop.f32.mrf.mxu0  ;;  %v263_v38 = vpop.f32.mrf.mxu1 }
  0xed   :  { %v336_v43 = vsel %vm331_vm0, %v231_v33, -1e+30  ;;  %v344_v46 = vsel %vm331_vm0, %v263_v38, -1e+30 }
  0xee   :  { %v601_v37 = vpop.f32.mrf.mxu0  ;;  %v609_v42 = vpop.f32.mrf.mxu1 }
  0xef   :  { %v339_v40 = vsel %vm331_vm0, %v601_v37, -1e+30  ;;  %v809_v49 = vsel %vm331_vm0, %v609_v42, -1e+30 }
  0xf0   :  { %366 = vmax.xlane.f32.xlu1 %v341_v35  ;;  %350 = vmax.xlane.f32.xlu0 %v333_v36  ;;  %v234_v41 = vpop.f32.mrf.mxu0  ;;  %v266_v45 = vpop.f32.mrf.mxu1 }
  0xf1   :  { %v337_v44 = vsel %vm331_vm0, %v234_v41, -1e+30  ;;  %v800_v47 = vsel %vm331_vm0, %v266_v45, -1e+30 }
  0xf4   :  { %360 = vmax.xlane.f32.xlu0 %v338_v39  ;;  %362 = vmax.xlane.f32.xlu1 %v339_v40 }
  0xf8   :  { %356 = vmax.xlane.f32.xlu0 %v336_v43  ;;  %358 = vmax.xlane.f32.xlu1 %v337_v44 }
  0xfc   :  { %372 = vmax.xlane.f32.xlu0 %v344_v46  ;;  %374 = vmax.xlane.f32.xlu1 %v800_v47 }
 0x100   :  { %376 = vmax.xlane.f32.xlu0 %v805_v48  ;;  %378 = vmax.xlane.f32.xlu1 %v809_v49 }
 0x16d   :  { %v369_v50 = vpop.xlane.xlu0 %368  ;;  %v353_v51 = vpop.xlane.xlu1 %352 }
 0x16e   :  { %v813_v52 = vsub.f32 %v342_v20, %v369_v50  ;;  %v815_v53 = vsub.f32 %v334_v21, %v353_v51 }
 0x170   :  { %v400_v54 = vmul.f32 1.442695, %v815_v53  ;;  %v416_v57 = vmul.f32 1.442695, %v813_v52 }
 0x171   :  { %v349_v55 = vpop.xlane.xlu0 %348  ;;  %v355_v56 = vpop.xlane.xlu1 %354 }
 0x172   :  { %v819_v58 = vsub.f32 %v332_v26, %v349_v55  ;;  %v821_v59 = vsub.f32 %v335_v27, %v355_v56  ;;  %642 = vpow2.f32 %v400_v54 }
 0x173   :  { %644 = vpow2.f32 %v416_v57 }
 0x174   :  { %v402_v60 = vmul.f32 1.442695, %v821_v59  ;;  %v396_v63 = vmul.f32 1.442695, %v819_v58 }
 0x175   :  { %v365_v61 = vpop.xlane.xlu0 %364  ;;  %v371_v62 = vpop.xlane.xlu1 %370 }
 0x176   :  { %v825_v0 = vsub.f32 %v340_v31, %v365_v61  ;;  %v827_v1 = vsub.f32 %v343_v32, %v371_v62  ;;  %646 = vpow2.f32 %v402_v60 }
 0x177   :  { %648 = vpow2.f32 %v396_v63 }
 0x178   :  { %v418_v2 = vmul.f32 1.442695, %v827_v1  ;;  %v412_v5 = vmul.f32 1.442695, %v825_v0 }
 0x179   :  { %v367_v3 = vpop.xlane.xlu1 %366  ;;  %v351_v4 = vpop.xlane.xlu0 %350 }
 0x17a   :  { %v831_v6 = vsub.f32 %v333_v36, %v351_v4  ;;  %650 = vpow2.f32 %v418_v2  ;;  %v833_v7 = vsub.f32 %v341_v35, %v367_v3 }
 0x17b   :  { %652 = vpow2.f32 %v412_v5 }
 0x17c   :  { %v398_v8 = vmul.f32 1.442695, %v831_v6  ;;  %v414_v12 = vmul.f32 1.442695, %v833_v7 }
 0x17d   :  { %v361_v9 = vpop.xlane.xlu0 %360  ;;  %v363_v10 = vpop.xlane.xlu1 %362 }
 0x17e   :  { %v836_v11 = vsub.f32 %v338_v39, %v361_v9  ;;  %654 = vpow2.f32 %v398_v8  ;;  %v839_v13 = vsub.f32 %v339_v40, %v363_v10 }
 0x17f   :  { %v643_v14 = vpop.eup %642 }
 0x180   :  { %v408_v15 = vmul.f32 1.442695, %v836_v11  ;;  %432 = vadd.xlane.f32.xlu0 %v643_v14  ;;  %v645_v20 = vpop.eup %644  ;;  %v410_v21 = vmul.f32 1.442695, %v839_v13 }
 0x181   :  { %v357_v16 = vpop.xlane.xlu0 %356  ;;  %v359_v18 = vpop.xlane.xlu1 %358 }
 0x182   :  { %656 = vpow2.f32 %v408_v15  ;;  %v842_v19 = vsub.f32 %v336_v43, %v357_v16  ;;  %v845_v22 = vsub.f32 %v337_v44, %v359_v18 }
 0x183   :  { %658 = vpow2.f32 %v414_v12  ;;  %v647_v23 = vpop.eup %646 }
 0x184   :  { %v404_v24 = vmul.f32 1.442695, %v842_v19  ;;  %448 = vadd.xlane.f32.xlu0 %v645_v20  ;;  %434 = vadd.xlane.f32.xlu1 %v647_v23  ;;  %v649_v28 = vpop.eup %648  ;;  %v406_v29 = vmul.f32 1.442695, %v845_v22 }
 0x185   :  { %v373_v25 = vpop.xlane.xlu0 %372  ;;  %v375_v26 = vpop.xlane.xlu1 %374 }
 0x186   :  { %660 = vpow2.f32 %v404_v24  ;;  %v848_v27 = vsub.f32 %v344_v46, %v373_v25  ;;  %v852_v30 = vsub.f32 %v800_v47, %v375_v26 }
 0x187   :  { %662 = vpow2.f32 %v410_v21  ;;  %v651_v31 = vpop.eup %650 }
 0x188   :  { %v420_v32 = vmul.f32 1.442695, %v848_v27  ;;  %428 = vadd.xlane.f32.xlu0 %v649_v28  ;;  %450 = vadd.xlane.f32.xlu1 %v651_v31  ;;  %v653_v36 = vpop.eup %652  ;;  %v422_v37 = vmul.f32 1.442695, %v852_v30 }
 0x189   :  { %v377_v33 = vpop.xlane.xlu0 %376  ;;  %v379_v34 = vpop.xlane.xlu1 %378 }
 0x18a   :  { %664 = vpow2.f32 %v420_v32  ;;  %v856_v35 = vsub.f32 %v805_v48, %v377_v33  ;;  %v860_v38 = vsub.f32 %v809_v49, %v379_v34 }
 0x18b   :  { %666 = vpow2.f32 %v406_v29  ;;  %v655_v39 = vpop.eup %654 }
 0x18c   :  { %v424_v40 = vmul.f32 1.442695, %v856_v35  ;;  %444 = vadd.xlane.f32.xlu0 %v653_v36  ;;  %430 = vadd.xlane.f32.xlu1 %v655_v39  ;;  %v426_v42 = vmul.f32 1.442695, %v860_v38 }
 0x18e   :  { %668 = vpow2.f32 %v424_v40 }
 0x18f   :  { %v657_v41 = vpop.eup %656  ;;  %670 = vpow2.f32 %v422_v37 }
 0x190   :  { %v659_v43 = vpop.eup %658  ;;  %440 = vadd.xlane.f32.xlu0 %v657_v41  ;;  %672 = vpow2.f32 %v426_v42 }
 0x191   :  { %446 = vadd.xlane.f32.xlu1 %v659_v43 }
 0x193   :  { %v661_v44 = vpop.eup %660 }
 0x194   :  { %v663_v45 = vpop.eup %662  ;;  %436 = vadd.xlane.f32.xlu0 %v661_v44 }
 0x195   :  { %442 = vadd.xlane.f32.xlu1 %v663_v45 }
 0x197   :  { %v665_v46 = vpop.eup %664 }
 0x198   :  { %v667_v47 = vpop.eup %666  ;;  %452 = vadd.xlane.f32.xlu0 %v665_v46 }
 0x199   :  { %438 = vadd.xlane.f32.xlu1 %v667_v47 }
 0x19b   :  { %v669_v48 = vpop.eup %668 }
 0x19c   :  { %v671_v49 = vpop.eup %670  ;;  %456 = vadd.xlane.f32.xlu0 %v669_v48 }
 0x19d   :  { %454 = vadd.xlane.f32.xlu1 %v671_v49  ;;  %v673_v50 = vpop.eup %672 }
 0x1a1   :  { %458 = vadd.xlane.f32.xlu1 %v673_v50 }
 0x209   :  { %v433_v51 = vpop.xlane.xlu0 %432 }
 0x20a   :  { %674 = vlog2.f32 %v433_v51 }
 0x20d   :  { %v449_v54 = vpop.xlane.xlu0 %448  ;;  %v435_v55 = vpop.xlane.xlu1 %434 }
 0x20e   :  { %676 = vlog2.f32 %v449_v54 }
 0x20f   :  { %678 = vlog2.f32 %v435_v55 }
 0x211   :  { %v429_v56 = vpop.xlane.xlu0 %428  ;;  %v451_v57 = vpop.xlane.xlu1 %450 }
 0x212   :  { %680 = vlog2.f32 %v429_v56 }
 0x213   :  { %682 = vlog2.f32 %v451_v57 }
 0x215   :  { %v445_v60 = vpop.xlane.xlu0 %444  ;;  %v431_v61 = vpop.xlane.xlu1 %430 }
 0x216   :  { %684 = vlog2.f32 %v445_v60 }
 0x217   :  { %v675_v62 = vpop.eup %674  ;;  %686 = vlog2.f32 %v431_v61 }
 0x218   :  { %v465_v63 = vmul.f32 0.6931472, %v675_v62 }
 0x219   :  { %v441_v2 = vpop.xlane.xlu0 %440 }
 0x21a   :  { %v447_v3 = vpop.xlane.xlu1 %446  ;;  %v494_v4 = vsub.f32 %v815_v53, %v465_v63  ;;  %688 = vlog2.f32 %v441_v2 }
 0x21b   :  { %v677_v5 = vpop.eup %676  ;;  %690 = vlog2.f32 %v447_v3 }
 0x21c   :  { %v679_v8 = vpop.eup %678  ;;  %v510_v9 = vsel %vm331_vm0, %v494_v4, 0.0  ;;  %v481_v10 = vmul.f32 0.6931472, %v677_v5 }
 0x21d   :  { %526 = vst [vmem:[%s962_s2 + $0x10] sm:$0xff] %v510_v9  ;;  %v467_v12 = vmul.f32 0.6931472, %v679_v8  ;;  %v437_v14 = vpop.xlane.xlu0 %436 }
 0x21e   :  { %v443_v15 = vpop.xlane.xlu1 %442  ;;  %v502_v16 = vsub.f32 %v813_v52, %v481_v10  ;;  %692 = vlog2.f32 %v437_v14 }
 0x21f   :  { %v681_v18 = vpop.eup %680  ;;  %v495_v53 = vsub.f32 %v821_v59, %v467_v12  ;;  %694 = vlog2.f32 %v443_v15 }
 0x220   :  { %v683_v20 = vpop.eup %682  ;;  %v518_v21 = vsel %vm331_vm0, %v502_v16, 0.0  ;;  %v461_v23 = vmul.f32 0.6931472, %v681_v18 }
 0x221   :  { %534 = vst [vmem:[%s962_s2 + $0x50] sm:$0xff] %v518_v21  ;;  %v511_v24 = vsel %vm331_vm0, %v495_v53, 0.0  ;;  %v483_v25 = vmul.f32 0.6931472, %v683_v20  ;;  %v453_v26 = vpop.xlane.xlu0 %452 }
 0x222   :  { %v439_v52 = vpop.xlane.xlu1 %438  ;;  %527 = vst [vmem:[%s962_s2 + $0x18] sm:$0xff] %v511_v24  ;;  %v492_v59 = vsub.f32 %v819_v58, %v461_v23  ;;  %696 = vlog2.f32 %v453_v26 }
 0x223   :  { %v685_v28 = vpop.eup %684  ;;  %v503_v29 = vsub.f32 %v827_v1, %v483_v25  ;;  %698 = vlog2.f32 %v439_v52 }
 0x224   :  { %v687_v31 = vpop.eup %686  ;;  %v508_v32 = vsel %vm331_vm0, %v492_v59, 0.0  ;;  %v477_v33 = vmul.f32 0.6931472, %v685_v28 }
 0x225   :  { %524 = vst [vmem:[%s962_s2] sm:$0xff] %v508_v32  ;;  %v519_v34 = vsel %vm331_vm0, %v503_v29, 0.0  ;;  %v463_v36 = vmul.f32 0.6931472, %v687_v31  ;;  %v457_v37 = vpop.xlane.xlu0 %456 }
 0x226   :  { %v455_v58 = vpop.xlane.xlu1 %454  ;;  %535 = vst [vmem:[%s962_s2 + $0x58] sm:$0xff] %v519_v34  ;;  %v500_v1 = vsub.f32 %v825_v0, %v477_v33  ;;  %700 = vlog2.f32 %v457_v37 }
 0x227   :  { %v689_v39 = vpop.eup %688  ;;  %v493_v40 = vsub.f32 %v831_v6, %v463_v36  ;;  %702 = vlog2.f32 %v455_v58 }
 0x228   :  { %v691_v41 = vpop.eup %690  ;;  %v516_v42 = vsel %vm331_vm0, %v500_v1, 0.0  ;;  %v473_v43 = vmul.f32 0.6931472, %v689_v39 }
 0x229   :  { %532 = vst [vmem:[%s962_s2 + $0x40] sm:$0xff] %v516_v42  ;;  %v509_v44 = vsel %vm331_vm0, %v493_v40, 0.0  ;;  %v479_v45 = vmul.f32 0.6931472, %v691_v41 }
 0x22a   :  { %v459_v46 = vpop.xlane.xlu1 %458  ;;  %525 = vst [vmem:[%s962_s2 + $0x8] sm:$0xff] %v509_v44  ;;  %v498_v0 = vsub.f32 %v836_v11, %v473_v43 }
 0x22b   :  { %704 = vlog2.f32 %v459_v46  ;;  %v693_v6 = vpop.eup %692  ;;  %v501_v47 = vsub.f32 %v833_v7, %v479_v45 }
 0x22c   :  { %v695_v48 = vpop.eup %694  ;;  %v514_v49 = vsel %vm331_vm0, %v498_v0, 0.0  ;;  %v469_v50 = vmul.f32 0.6931472, %v693_v6 }
 0x22d   :  { %530 = vst [vmem:[%s962_s2 + $0x30] sm:$0xff] %v514_v49  ;;  %v517_v51 = vsel %vm331_vm0, %v501_v47, 0.0  ;;  %v475_v54 = vmul.f32 0.6931472, %v695_v48 }
 0x22e   :  { %533 = vst [vmem:[%s962_s2 + $0x48] sm:$0xff] %v517_v51  ;;  %v496_v11 = vsub.f32 %v842_v19, %v469_v50 }
 0x22f   :  { %v697_v7 = vpop.eup %696  ;;  %v499_v55 = vsub.f32 %v839_v13, %v475_v54 }
 0x230   :  { %v699_v56 = vpop.eup %698  ;;  %v512_v57 = vsel %vm331_vm0, %v496_v11, 0.0  ;;  %v485_v60 = vmul.f32 0.6931472, %v697_v7 }
 0x231   :  { %528 = vst [vmem:[%s962_s2 + $0x20] sm:$0xff] %v512_v57  ;;  %v515_v61 = vsel %vm331_vm0, %v499_v55, 0.0  ;;  %v471_v62 = vmul.f32 0.6931472, %v699_v56 }
 0x232   :  { %531 = vst [vmem:[%s962_s2 + $0x38] sm:$0xff] %v515_v61  ;;  %v504_v19 = vsub.f32 %v848_v27, %v485_v60 }
 0x233   :  { %v701_v13 = vpop.eup %700  ;;  %v497_v63 = vsub.f32 %v845_v22, %v471_v62 }
 0x234   :  { %v703_v2 = vpop.eup %702  ;;  %v520_v3 = vsel %vm331_vm0, %v504_v19, 0.0  ;;  %v489_v4 = vmul.f32 0.6931472, %v701_v13 }
 0x235   :  { %536 = vst [vmem:[%s962_s2 + $0x60] sm:$0xff] %v520_v3  ;;  %v513_v5 = vsel %vm331_vm0, %v497_v63, 0.0  ;;  %v487_v8 = vmul.f32 0.6931472, %v703_v2 }
 0x236   :  { %529 = vst [vmem:[%s962_s2 + $0x28] sm:$0xff] %v513_v5  ;;  %v506_v27 = vsub.f32 %v856_v35, %v489_v4 }
 0x237   :  { %v505_v9 = vsub.f32 %v852_v30, %v487_v8 }
 0x238   :  { %v705_v22 = vpop.eup %704  ;;  %v522_v10 = vsel %vm331_vm0, %v506_v27, 0.0 }
 0x239   :  { %v491_v12 = vmul.f32 0.6931472, %v705_v22  ;;  %538 = vst [vmem:[%s962_s2 + $0x70] sm:$0xff] %v522_v10  ;;  %v521_v14 = vsel %vm331_vm0, %v505_v9, 0.0 }
 0x23a   :  { %537 = vst [vmem:[%s962_s2 + $0x68] sm:$0xff] %v521_v14 }
 0x23b   :  { %v507_v35 = vsub.f32 %v860_v38, %v491_v12 }
 0x23d   :  { %v523_v30 = vsel %vm331_vm0, %v507_v35, 0.0 }
 0x23e   :  { %539 = vst [vmem:[%s962_s2 + $0x78] sm:$0xff] %v523_v30 }

// kernel: gcn_forward.4
= control target key start
LH: loop header
LB: loop body
LE: loop exit
PB: predicated region body
PF: predicated region fallthrough
CT: control target
= control target key end

     0   :  { %s942_s1 = inlined_call_operand.vmem [shape: bf16[128,128], index: 1, kind: input, shape index: {}]   ;;  %s943_s0 = inlined_call_operand.vmem [shape: bf16[128,128], index: 0, kind: input, shape index: {}]   ;;  %s944_s2 = inlined_call_operand.vmem [shape: bf16[128,128], index: 2, kind: input, shape index: {}]   ;;  %s945_s3 = inlined_call_operand.vmem [shape: bf16[128,128], index: 3, kind: output, shape index: {}]  }
   0x1   :  { %v802_v0 = vld [vmem:[%s942_s1 + $0x38] sm:$0xff]   ;;  %v803_v1 = vld [vmem:[%s942_s1 + $0x30] sm:$0xff]   ;;  %v804_v2 = vld [vmem:[%s942_s1 + $0x28] sm:$0xff]  }
   0x2   :  { %738 = vmatprep.subr.bf16.mxu0 %v802_v0  ;;  %v805_v3 = vld [vmem:[%s942_s1 + $0x20] sm:$0xff]   ;;  %v806_v5 = vld [vmem:[%s942_s1 + $0x18] sm:$0xff]   ;;  %v807_v6 = vld [vmem:[%s942_s1 + $0x10] sm:$0xff]  }
   0x3   :  { %739 = vmatpush3.bf16.msra.mxu0 %v802_v0  ;;  %v810_v4 = vld [vmem:[%s943_s0] sm:$0xff]   ;;  %v818_v7 = vld [vmem:[%s944_s2 + $0x38] sm:$0xff]   ;;  %v819_v8 = vld [vmem:[%s944_s2 + $0x30] sm:$0xff]  }
   0x4   :  { %740 = vmatprep.subr.bf16.mxu0 %v803_v1  ;;  %754 = vmatprep.mubr.bf16.mxu0 %v810_v4  ;;  %v808_v9 = vld [vmem:[%s942_s1 + $0x8] sm:$0xff]   ;;  %v809_v11 = vld [vmem:[%s942_s1] sm:$0xff]   ;;  %v822_v13 = vld [vmem:[%s944_s2 + $0x18] sm:$0xff]  }
   0x5   :  { %770 = vmatprep.subr.bf16.mxu1 %v818_v7  ;;  %v820_v10 = vld [vmem:[%s944_s2 + $0x28] sm:$0xff]   ;;  %v821_v12 = vld [vmem:[%s944_s2 + $0x20] sm:$0xff]   ;;  %v812_v15 = vld [vmem:[%s943_s0 + $0x10] sm:$0xff]  }
   0x6   :  { %771 = vmatpush3.bf16.msra.mxu1 %v818_v7  ;;  %v811_v14 = vld [vmem:[%s943_s0 + $0x8] sm:$0xff]   ;;  %v813_v16 = vld [vmem:[%s943_s0 + $0x18] sm:$0xff]   ;;  %v814_v17 = vld [vmem:[%s943_s0 + $0x20] sm:$0xff]  }
   0x7   :  { %741 = vmatpush3.bf16.msra.mxu0 %v803_v1  ;;  %772 = vmatprep.subr.bf16.mxu1 %v819_v8  ;;  %v815_v18 = vld [vmem:[%s943_s0 + $0x28] sm:$0xff]   ;;  %v816_v19 = vld [vmem:[%s943_s0 + $0x30] sm:$0xff]   ;;  %v817_v20 = vld [vmem:[%s943_s0 + $0x38] sm:$0xff]  }
   0x8   :  { %742 = vmatprep.subr.bf16.mxu0 %v804_v2  ;;  %v823_v21 = vld [vmem:[%s944_s2 + $0x10] sm:$0xff]   ;;  %v824_v22 = vld [vmem:[%s944_s2 + $0x8] sm:$0xff]   ;;  %v825_v23 = vld [vmem:[%s944_s2] sm:$0xff]  }
   0xa   :  { %773 = vmatpush3.bf16.msra.mxu1 %v819_v8 }
   0xb   :  { %743 = vmatpush3.bf16.msra.mxu0 %v804_v2  ;;  %774 = vmatprep.subr.bf16.mxu1 %v820_v10 }
   0xc   :  { %744 = vmatprep.subr.bf16.mxu0 %v805_v3 }
   0xe   :  { %775 = vmatpush3.bf16.msra.mxu1 %v820_v10 }
   0xf   :  { %745 = vmatpush3.bf16.msra.mxu0 %v805_v3  ;;  %776 = vmatprep.subr.bf16.mxu1 %v821_v12 }
  0x10   :  { %746 = vmatprep.subr.bf16.mxu0 %v806_v5 }
  0x12   :  { %777 = vmatpush3.bf16.msra.mxu1 %v821_v12 }
  0x13   :  { %747 = vmatpush3.bf16.msra.mxu0 %v806_v5  ;;  %778 = vmatprep.subr.bf16.mxu1 %v822_v13 }
  0x14   :  { %748 = vmatprep.subr.bf16.mxu0 %v807_v6 }
  0x16   :  { %779 = vmatpush3.bf16.msra.mxu1 %v822_v13 }
  0x17   :  { %749 = vmatpush3.bf16.msra.mxu0 %v807_v6  ;;  %780 = vmatprep.subr.bf16.mxu1 %v823_v21 }
  0x18   :  { %750 = vmatprep.subr.bf16.mxu0 %v808_v9 }
  0x1a   :  { %781 = vmatpush3.bf16.msra.mxu1 %v823_v21 }
  0x1b   :  { %751 = vmatpush3.bf16.msra.mxu0 %v808_v9  ;;  %782 = vmatprep.subr.bf16.mxu1 %v824_v22 }
  0x1c   :  { %752 = vmatprep.subr.bf16.mxu0 %v809_v11 }
  0x1e   :  { %783 = vmatpush3.bf16.msra.mxu1 %v824_v22 }
  0x1f   :  { %753 = vmatpush3.bf16.msra.mxu0 %v809_v11  ;;  %784 = vmatprep.subr.bf16.mxu1 %v825_v23 }
  0x22   :  { %755 = vmatmul.mubr.bf16.vlgmr.msra.gmra.mxu0 %v811_v14  ;;  %785 = vmatpush3.bf16.msra.mxu1 %v825_v23 }
  0x23   :  { %758 = vmatprep.mubr.bf16.mxu0 %v812_v15 }
  0x2a   :  { %759 = vmatmul.mubr.bf16.gmra.mxu0 %v813_v16 }
  0x2b   :  { %762 = vmatprep.mubr.bf16.mxu0 %v814_v17 }
  0x32   :  { %763 = vmatmul.mubr.bf16.gmra.mxu0 %v815_v18 }
  0x33   :  { %766 = vmatprep.mubr.bf16.mxu0 %v816_v19 }
  0x3a   :  { %767 = vmatmul.mubr.bf16.gmra.mxu0 %v817_v20 }
  0xe2   :  { %v756_v24 = vpop.f32.mrf.mxu0 }
  0xe3   :  { %v334_v31 = vmax.f32 %v756_v24, 0.0 }
  0xe4   :  { %v218_v25 = vpop.f32.mrf.mxu0 }
  0xe5   :  { %v332_v29 = vmax.f32 %v218_v25, 0.0 }
  0xe6   :  { %v757_v26 = vpop.f32.mrf.mxu0 }
  0xe7   :  { %v335_v27 = vmax.f32 %v757_v26, 0.0 }
  0xe8   :  { %v221_v28 = vpop.f32.mrf.mxu0 }
  0xe9   :  { %v333_v30 = vmax.f32 %v221_v28, 0.0  ;;  %v349_v34 = vpack.c.bf16 %v335_v27, %v334_v31 }
  0xea   :  { %v760_v32 = vpop.f32.mrf.mxu0 }
  0xeb   :  { %v348_v33 = vpack.c.bf16 %v333_v30, %v332_v29  ;;  %v338_v41 = vmax.f32 %v760_v32, 0.0 }
  0xec   :  { %v234_v35 = vpop.f32.mrf.mxu0 }
  0xed   :  { %786 = vmatprep.mubr.bf16.mxu1 %v348_v33  ;;  %v336_v39 = vmax.f32 %v234_v35, 0.0 }
  0xee   :  { %v761_v36 = vpop.f32.mrf.mxu0  ;;  %787 = vmatmul.mubr.bf16.vlgmr.msra.gmra.mxu1 %v349_v34 }
  0xef   :  { %v339_v37 = vmax.f32 %v761_v36, 0.0 }
  0xf0   :  { %v237_v38 = vpop.f32.mrf.mxu0 }
  0xf1   :  { %v337_v40 = vmax.f32 %v237_v38, 0.0  ;;  %v351_v44 = vpack.c.bf16 %v339_v37, %v338_v41 }
  0xf2   :  { %v764_v42 = vpop.f32.mrf.mxu0 }
  0xf3   :  { %v350_v43 = vpack.c.bf16 %v337_v40, %v336_v39  ;;  %v342_v51 = vmax.f32 %v764_v42, 0.0 }
  0xf4   :  { %v250_v45 = vpop.f32.mrf.mxu0 }
  0xf5   :  { %790 = vmatprep.mubr.bf16.mxu1 %v350_v43  ;;  %v340_v49 = vmax.f32 %v250_v45, 0.0 }
  0xf6   :  { %v765_v46 = vpop.f32.mrf.mxu0  ;;  %791 = vmatmul.mubr.bf16.gmra.mxu1 %v351_v44 }
  0xf7   :  { %v343_v47 = vmax.f32 %v765_v46, 0.0 }
  0xf8   :  { %v253_v48 = vpop.f32.mrf.mxu0 }
  0xf9   :  { %v341_v50 = vmax.f32 %v253_v48, 0.0  ;;  %v353_v54 = vpack.c.bf16 %v343_v47, %v342_v51 }
  0xfa   :  { %v768_v52 = vpop.f32.mrf.mxu0 }
  0xfb   :  { %v352_v53 = vpack.c.bf16 %v341_v50, %v340_v49  ;;  %v346_v61 = vmax.f32 %v768_v52, 0.0 }
  0xfc   :  { %v266_v55 = vpop.f32.mrf.mxu0 }
  0xfd   :  { %794 = vmatprep.mubr.bf16.mxu1 %v352_v53  ;;  %v344_v59 = vmax.f32 %v266_v55, 0.0 }
  0xfe   :  { %v769_v56 = vpop.f32.mrf.mxu0  ;;  %795 = vmatmul.mubr.bf16.gmra.mxu1 %v353_v54 }
  0xff   :  { %v347_v57 = vmax.f32 %v769_v56, 0.0 }
 0x100   :  { %v269_v58 = vpop.f32.mrf.mxu0 }
 0x101   :  { %v345_v60 = vmax.f32 %v269_v58, 0.0  ;;  %v355_v63 = vpack.c.bf16 %v347_v57, %v346_v61 }
 0x103   :  { %v354_v62 = vpack.c.bf16 %v345_v60, %v344_v59 }
 0x105   :  { %798 = vmatprep.mubr.bf16.mxu1 %v354_v62 }
 0x106   :  { %799 = vmatmul.mubr.bf16.gmra.mxu1 %v355_v63 }
 0x1ae   :  { %v788_v0 = vpop.f32.mrf.mxu1 }
 0x1b0   :  { %v454_v1 = vpop.f32.mrf.mxu1 }
 0x1b2   :  { %v789_v2 = vpop.f32.mrf.mxu1 }
 0x1b3   :  { %v667_v3 = vpack.c.bf16 %v789_v2, %v788_v0 }
 0x1b4   :  { %v457_v4 = vpop.f32.mrf.mxu1 }
 0x1b5   :  { %699 = vst [vmem:[%s945_s3 + $0x8] sm:$0xff] %v667_v3   ;;  %v662_v5 = vpack.c.bf16 %v457_v4, %v454_v1 }
 0x1b6   :  { %v792_v6 = vpop.f32.mrf.mxu1 }
 0x1b7   :  { %663 = vst [vmem:[%s945_s3] sm:$0xff] %v662_v5  }
 0x1b8   :  { %v470_v7 = vpop.f32.mrf.mxu1 }
 0x1ba   :  { %v793_v8 = vpop.f32.mrf.mxu1 }
 0x1bb   :  { %v677_v9 = vpack.c.bf16 %v793_v8, %v792_v6 }
 0x1bc   :  { %v473_v10 = vpop.f32.mrf.mxu1 }
 0x1bd   :  { %701 = vst [vmem:[%s945_s3 + $0x18] sm:$0xff] %v677_v9   ;;  %v672_v11 = vpack.c.bf16 %v473_v10, %v470_v7 }
 0x1be   :  { %v796_v12 = vpop.f32.mrf.mxu1 }
 0x1bf   :  { %700 = vst [vmem:[%s945_s3 + $0x10] sm:$0xff] %v672_v11  }
 0x1c0   :  { %v486_v13 = vpop.f32.mrf.mxu1 }
 0x1c2   :  { %v797_v14 = vpop.f32.mrf.mxu1 }
 0x1c3   :  { %v687_v15 = vpack.c.bf16 %v797_v14, %v796_v12 }
 0x1c4   :  { %v489_v16 = vpop.f32.mrf.mxu1 }
 0x1c5   :  { %703 = vst [vmem:[%s945_s3 + $0x28] sm:$0xff] %v687_v15   ;;  %v682_v17 = vpack.c.bf16 %v489_v16, %v486_v13 }
 0x1c6   :  { %v800_v18 = vpop.f32.mrf.mxu1 }
 0x1c7   :  { %702 = vst [vmem:[%s945_s3 + $0x20] sm:$0xff] %v682_v17  }
 0x1c8   :  { %v502_v19 = vpop.f32.mrf.mxu1 }
 0x1ca   :  { %v801_v20 = vpop.f32.mrf.mxu1 }
 0x1cb   :  { %v697_v21 = vpack.c.bf16 %v801_v20, %v800_v18 }
 0x1cc   :  { %v505_v22 = vpop.f32.mrf.mxu1 }
 0x1cd   :  { %705 = vst [vmem:[%s945_s3 + $0x38] sm:$0xff] %v697_v21   ;;  %v692_v23 = vpack.c.bf16 %v505_v22, %v502_v19 }
 0x1cf   :  { %704 = vst [vmem:[%s945_s3 + $0x30] sm:$0xff] %v692_v23  }

// kernel: gcn_forward.3
= control target key start
LH: loop header
LB: loop body
LE: loop exit
PB: predicated region body
PF: predicated region fallthrough
CT: control target
= control target key end

     0   :  { %s583_s1 = inlined_call_operand.vmem [shape: bf16[128,128], index: 1, kind: input, shape index: {}]   ;;  %s584_s0 = inlined_call_operand.vmem [shape: bf16[128,128], index: 0, kind: input, shape index: {}]   ;;  %s585_s2 = inlined_call_operand.vmem [shape: bf16[128,128], index: 2, kind: output, shape index: {}]  }
   0x1   :  { %v480_v0 = vld [vmem:[%s583_s1 + $0x38] sm:$0xff]   ;;  %v481_v1 = vld [vmem:[%s583_s1 + $0x30] sm:$0xff]   ;;  %v482_v2 = vld [vmem:[%s583_s1 + $0x28] sm:$0xff]  }
   0x2   :  { %432 = vmatprep.subr.bf16.mxu0 %v480_v0  ;;  %464 = vmatprep.subr.bf16.mxu1 %v480_v0  ;;  %v483_v3 = vld [vmem:[%s583_s1 + $0x20] sm:$0xff]   ;;  %v484_v6 = vld [vmem:[%s583_s1 + $0x18] sm:$0xff]   ;;  %v485_v7 = vld [vmem:[%s583_s1 + $0x10] sm:$0xff]  }
   0x3   :  { %433 = vmatpush3.bf16.msra.mxu0 %v480_v0  ;;  %472 = vmatpush3.bf16.msra.mxu1 %v480_v0  ;;  %v488_v4 = vld [vmem:[%s584_s0] sm:$0xff]   ;;  %v486_v8 = vld [vmem:[%s583_s1 + $0x8] sm:$0xff]   ;;  %v492_v12 = vld [vmem:[%s584_s0 + $0x10] sm:$0xff]  }
   0x4   :  { %434 = vmatprep.subr.bf16.mxu0 %v481_v1  ;;  %465 = vmatprep.subr.bf16.mxu1 %v481_v1  ;;  %v489_v5 = vld [vmem:[%s584_s0 + $0x20] sm:$0xff]   ;;  %v490_v10 = vld [vmem:[%s584_s0 + $0x8] sm:$0xff]   ;;  %v493_v13 = vld [vmem:[%s584_s0 + $0x30] sm:$0xff]  }
   0x5   :  { %448 = vmatprep.mubr.bf16.mxu0 %v488_v4  ;;  %456 = vmatprep.mubr.bf16.mxu1 %v489_v5  ;;  %v487_v9 = vld [vmem:[%s583_s1] sm:$0xff]   ;;  %v491_v11 = vld [vmem:[%s584_s0 + $0x28] sm:$0xff]   ;;  %v494_v14 = vld [vmem:[%s584_s0 + $0x18] sm:$0xff]  }
   0x6   :  { %v495_v15 = vld [vmem:[%s584_s0 + $0x38] sm:$0xff]  }
   0x7   :  { %435 = vmatpush3.bf16.msra.mxu0 %v481_v1  ;;  %473 = vmatpush3.bf16.msra.mxu1 %v481_v1 }
   0x8   :  { %436 = vmatprep.subr.bf16.mxu0 %v482_v2  ;;  %466 = vmatprep.subr.bf16.mxu1 %v482_v2 }
   0xb   :  { %437 = vmatpush3.bf16.msra.mxu0 %v482_v2  ;;  %474 = vmatpush3.bf16.msra.mxu1 %v482_v2 }
   0xc   :  { %438 = vmatprep.subr.bf16.mxu0 %v483_v3  ;;  %467 = vmatprep.subr.bf16.mxu1 %v483_v3 }
   0xf   :  { %439 = vmatpush3.bf16.msra.mxu0 %v483_v3  ;;  %475 = vmatpush3.bf16.msra.mxu1 %v483_v3 }
  0x10   :  { %440 = vmatprep.subr.bf16.mxu0 %v484_v6  ;;  %468 = vmatprep.subr.bf16.mxu1 %v484_v6 }
  0x13   :  { %441 = vmatpush3.bf16.msra.mxu0 %v484_v6  ;;  %476 = vmatpush3.bf16.msra.mxu1 %v484_v6 }
  0x14   :  { %442 = vmatprep.subr.bf16.mxu0 %v485_v7  ;;  %469 = vmatprep.subr.bf16.mxu1 %v485_v7 }
  0x17   :  { %443 = vmatpush3.bf16.msra.mxu0 %v485_v7  ;;  %477 = vmatpush3.bf16.msra.mxu1 %v485_v7 }
  0x18   :  { %444 = vmatprep.subr.bf16.mxu0 %v486_v8  ;;  %470 = vmatprep.subr.bf16.mxu1 %v486_v8 }
  0x1b   :  { %445 = vmatpush3.bf16.msra.mxu0 %v486_v8  ;;  %478 = vmatpush3.bf16.msra.mxu1 %v486_v8 }
  0x1c   :  { %446 = vmatprep.subr.bf16.mxu0 %v487_v9  ;;  %471 = vmatprep.subr.bf16.mxu1 %v487_v9 }
  0x1f   :  { %447 = vmatpush3.bf16.msra.mxu0 %v487_v9  ;;  %479 = vmatpush3.bf16.msra.mxu1 %v487_v9 }
  0x22   :  { %449 = vmatmul.mubr.bf16.vlgmr.msra.gmra.mxu0 %v490_v10  ;;  %457 = vmatmul.mubr.bf16.vlgmr.msra.gmra.mxu1 %v491_v11 }
  0x23   :  { %452 = vmatprep.mubr.bf16.mxu0 %v492_v12  ;;  %460 = vmatprep.mubr.bf16.mxu1 %v493_v13 }
  0x2a   :  { %453 = vmatmul.mubr.bf16.gmra.mxu0 %v494_v14  ;;  %461 = vmatmul.mubr.bf16.gmra.mxu1 %v495_v15 }
  0xe2   :  { %v450_v16 = vpop.f32.mrf.mxu0  ;;  %v458_v17 = vpop.f32.mrf.mxu1 }
  0xe4   :  { %v174_v18 = vpop.f32.mrf.mxu0  ;;  %v206_v19 = vpop.f32.mrf.mxu1 }
  0xe6   :  { %v451_v20 = vpop.f32.mrf.mxu0  ;;  %v459_v21 = vpop.f32.mrf.mxu1 }
  0xe7   :  { %v377_v22 = vpack.c.bf16 %v451_v20, %v450_v16  ;;  %v397_v23 = vpack.c.bf16 %v459_v21, %v458_v17 }
  0xe8   :  { %v177_v24 = vpop.f32.mrf.mxu0  ;;  %v209_v25 = vpop.f32.mrf.mxu1 }
  0xe9   :  { %409 = vst [vmem:[%s585_s2 + $0x8] sm:$0xff] %v377_v22   ;;  %413 = vst [vmem:[%s585_s2 + $0x28] sm:$0xff] %v397_v23   ;;  %v372_v26 = vpack.c.bf16 %v177_v24, %v174_v18  ;;  %v392_v27 = vpack.c.bf16 %v209_v25, %v206_v19 }
  0xea   :  { %v454_v28 = vpop.f32.mrf.mxu0  ;;  %v462_v29 = vpop.f32.mrf.mxu1 }
  0xeb   :  { %373 = vst [vmem:[%s585_s2] sm:$0xff] %v372_v26   ;;  %412 = vst [vmem:[%s585_s2 + $0x20] sm:$0xff] %v392_v27  }
  0xec   :  { %v190_v30 = vpop.f32.mrf.mxu0  ;;  %v222_v31 = vpop.f32.mrf.mxu1 }
  0xee   :  { %v455_v32 = vpop.f32.mrf.mxu0  ;;  %v463_v33 = vpop.f32.mrf.mxu1 }
  0xef   :  { %v387_v34 = vpack.c.bf16 %v455_v32, %v454_v28  ;;  %v407_v35 = vpack.c.bf16 %v463_v33, %v462_v29 }
  0xf0   :  { %v193_v36 = vpop.f32.mrf.mxu0  ;;  %v225_v37 = vpop.f32.mrf.mxu1 }
  0xf1   :  { %411 = vst [vmem:[%s585_s2 + $0x18] sm:$0xff] %v387_v34   ;;  %415 = vst [vmem:[%s585_s2 + $0x38] sm:$0xff] %v407_v35   ;;  %v382_v38 = vpack.c.bf16 %v193_v36, %v190_v30  ;;  %v402_v39 = vpack.c.bf16 %v225_v37, %v222_v31 }
  0xf3   :  { %410 = vst [vmem:[%s585_s2 + $0x10] sm:$0xff] %v382_v38   ;;  %414 = vst [vmem:[%s585_s2 + $0x30] sm:$0xff] %v402_v39  }

</bundles_post_ra>
